<compile_context>
chip_gen: v7x
topology: tpu7x:2x2x1
jax: 0.10.0
libtpu: 0.0.40
codegen_flags: <defaults>
</compile_context>

<pallas_src>
import functools

import jax
import jax.numpy as jnp
from jax.experimental import pallas as pl
from jax.experimental.pallas import tpu as pltpu

EPS = 0.0      # GINConv default eps. (1+EPS) is folded into the int8 adjacency,
               # so it must be an exact small integer (true for the default 0.0).
LANE = 128     # TPU lane width
VMEM_LIMIT = 48 * 1024 * 1024


def _round_up(x, m):
    return (x + m - 1) // m * m


def _pool_chunk(n_pad, tile_eff, cap=2048):
    """Largest multiple of tile_eff that divides n_pad and is <= cap."""
    nt = n_pad // tile_eff
    best = 1
    for d in range(1, nt + 1):
        if nt % d == 0 and tile_eff * d <= cap:
            best = d
    return tile_eff * best


# -----------------------------------------------------------------------------
# One GINConv layer:  out_row_tile = act( (sum_k A'[i,k] @ X[k]) @ W + b )
#   A' int8 in HBM -> bf16 in-kernel; X resident f32 in VMEM, k-slice cast to
#   bf16 for the aggregation MXU push; f32 accumulator scratch; dense linear +
#   bias + optional ReLU fused into the k==last epilogue.
# -----------------------------------------------------------------------------
def gin_conv_kernel(a_ref, x_ref, w_ref, b_ref, o_ref, acc_ref, *, tk, apply_relu):
    k = pl.program_id(1)

    @pl.when(k == 0)
    def _():
        acc_ref[...] = jnp.zeros_like(acc_ref)

    a = a_ref[...].astype(jnp.bfloat16)                  # int8 -> bf16 (VPU, idle slot)
    off = pl.multiple_of(k * tk, tk)
    xs = x_ref[pl.ds(off, tk), :].astype(jnp.bfloat16)   # resident activations slice
    acc_ref[...] += jnp.dot(a, xs, preferred_element_type=jnp.float32)

    @pl.when(k == pl.num_programs(1) - 1)
    def _():
        h = jnp.dot(acc_ref[...], w_ref[...], preferred_element_type=jnp.float32) + b_ref[...]
        if apply_relu:
            h = jnp.maximum(h, 0.0)
        o_ref[...] = h.astype(o_ref.dtype)


def gin_conv_layer(a_i8, x_in, w, b, *, apply_relu, tm, tk):
    n_pad = a_i8.shape[0]
    fin = x_in.shape[1]
    fout = w.shape[1]
    grid = (n_pad // tm, n_pad // tk)

    flops = 2 * n_pad * n_pad * fin + 2 * n_pad * fin * fout
    bytes_accessed = int(
        a_i8.size * 1                    # int8 adjacency streamed once
        + x_in.size * 4                  # activations read once (VMEM-resident)
        + w.size * 4 + b.size * 4
        + n_pad * fout * 4               # output writeback
    )

    return pl.pallas_call(
        functools.partial(gin_conv_kernel, tk=tk, apply_relu=apply_relu),
        out_shape=jax.ShapeDtypeStruct((n_pad, fout), jnp.float32),
        grid_spec=pltpu.PrefetchScalarGridSpec(
            num_scalar_prefetch=0,
            grid=grid,
            in_specs=[
                pl.BlockSpec((tm, tk), lambda i, k: (i, k)),       # A' tile (int8)
                pl.BlockSpec((n_pad, fin), lambda i, k: (0, 0)),   # X resident (f32)
                pl.BlockSpec((fin, fout), lambda i, k: (0, 0)),    # W resident (f32)
                pl.BlockSpec((1, fout), lambda i, k: (0, 0)),      # b resident (f32)
            ],
            out_specs=pl.BlockSpec((tm, fout), lambda i, k: (i, 0)),
            scratch_shapes=[pltpu.VMEM((tm, fin), jnp.float32)],   # agg accumulator
        ),
        compiler_params=pltpu.CompilerParams(
            dimension_semantics=("parallel", "arbitrary"),
            vmem_limit_bytes=VMEM_LIMIT,
        ),
        cost_estimate=pl.CostEstimate(
            flops=flops, transcendentals=0, bytes_accessed=bytes_accessed
        ),
    )(a_i8, x_in, w, b)


# -----------------------------------------------------------------------------
# Global mean pool:  out = P @ H2, accumulated across large node chunks.
# Kept as a separate (tiny-grid) kernel so layer 2 keeps its "parallel" row axis
# for megacore on v7x.
# -----------------------------------------------------------------------------
def mean_pool_kernel(p_ref, h_ref, o_ref):
    k = pl.program_id(0)

    @pl.when(k == 0)
    def _():
        o_ref[...] = jnp.zeros_like(o_ref)

    o_ref[...] += jnp.dot(p_ref[...], h_ref[...], preferred_element_type=jnp.float32)


def mean_pool(pool_mat, h, *, tk):
    g, n_pad = pool_mat.shape
    c = h.shape[1]
    return pl.pallas_call(
        mean_pool_kernel,
        out_shape=jax.ShapeDtypeStruct((g, c), jnp.float32),
        grid_spec=pltpu.PrefetchScalarGridSpec(
            num_scalar_prefetch=0,
            grid=(n_pad // tk,),
            in_specs=[
                pl.BlockSpec((g, tk), lambda k: (0, k)),
                pl.BlockSpec((tk, c), lambda k: (k, 0)),
            ],
            out_specs=pl.BlockSpec((g, c), lambda k: (0, 0)),
        ),
        compiler_params=pltpu.CompilerParams(
            dimension_semantics=("arbitrary",),
            vmem_limit_bytes=VMEM_LIMIT,
        ),
        cost_estimate=pl.CostEstimate(
            flops=2 * g * n_pad * c,
            transcendentals=0,
            bytes_accessed=int((g * n_pad + n_pad * c + g * c) * 4),
        ),
    )(pool_mat, h)


# -----------------------------------------------------------------------------
# Full forward pass.
# -----------------------------------------------------------------------------
def gin_forward(x, edge_index, batch, params, num_graphs, tile=512):
    """x: [N, F] f32, edge_index: [2, E] i32, batch: [N] i32 -> [G, C] f32."""
    n, f = x.shape
    w1, b1, w2, b2 = params
    hdim = w1.shape[1]
    cdim = w2.shape[1]

    # Tile clamped so small graphs still get a valid (8,128)-aligned grid; for
    # large graphs n_pad/tile >= 2 keeps both v7x TensorCores fed.
    tile_eff = min(tile, _round_up(n, LANE))
    n_pad = _round_up(n, tile_eff)
    f_pad = _round_up(max(f, LANE), LANE)
    h_pad = _round_up(max(hdim, LANE), LANE)
    c_pad = _round_up(max(cdim, LANE), LANE)

    src, dst = edge_index[0], edge_index[1]

    # A' = A + (1+eps) I, built directly in int8 (exact for multiplicity <= 127).
    diag = jnp.arange(n_pad, dtype=jnp.int32)
    a_i8 = (
        jnp.zeros((n_pad, n_pad), jnp.int8)
        .at[dst, src].add(jnp.int8(1))
        .at[diag, diag].add(jnp.int8(round(1.0 + EPS)))
    )

    # Padded node features, kept f32 (bf16 cast happens per-tile inside the kernel).
    x_p = jnp.zeros((n_pad, f_pad), jnp.float32).at[:n, :f].set(x)

    # Zero-padded weights / biases (lane-dense 128-wide).
    w1_p = jnp.zeros((f_pad, h_pad), jnp.float32).at[:f, :hdim].set(w1)
    b1_p = jnp.zeros((1, h_pad), jnp.float32).at[:, :hdim].set(b1)
    w2_p = jnp.zeros((h_pad, c_pad), jnp.float32).at[:hdim, :cdim].set(w2)
    b2_p = jnp.zeros((1, c_pad), jnp.float32).at[:, :cdim].set(b2)

    # Mean-pool matrix [G, N_pad]; padded nodes get batch id -1 -> zero weight.
    batch_p = jnp.full((n_pad,), -1, jnp.int32).at[:n].set(batch.astype(jnp.int32))
    onehot = (batch_p[None, :] == jnp.arange(num_graphs)[:, None]).astype(jnp.float32)
    counts = jnp.maximum(onehot.sum(axis=1, keepdims=True), 1.0)
    pool_mat = onehot / counts

    # Layer 1: ReLU(Linear1(A' @ x)); h1 stays f32 in HBM.
    h1 = gin_conv_layer(a_i8, x_p, w1_p, b1_p, apply_relu=True, tm=tile_eff, tk=tile_eff)
    # Layer 2: Linear2(A' @ h1).
    h2 = gin_conv_layer(a_i8, h1, w2_p, b2_p, apply_relu=False, tm=tile_eff, tk=tile_eff)
    # Global mean pool.
    out = mean_pool(pool_mat, h2, tk=_pool_chunk(n_pad, tile_eff))
    return out[:, :cdim]


def init_params(key, num_feats, hidden_channels, num_classes):
    # Deterministic init mirroring nn.Linear (uniform +/- 1/sqrt(fan_in)).
    k1, k2, k3, k4 = jax.random.split(key, 4)
    bound1 = 1.0 / jnp.sqrt(num_feats)
    bound2 = 1.0 / jnp.sqrt(hidden_channels)
    w1 = jax.random.uniform(k1, (num_feats, hidden_channels), jnp.float32, -bound1, bound1)
    b1 = jax.random.uniform(k2, (1, hidden_channels), jnp.float32, -bound1, bound1)
    w2 = jax.random.uniform(k3, (hidden_channels, num_classes), jnp.float32, -bound2, bound2)
    b2 = jax.random.uniform(k4, (1, num_classes), jnp.float32, -bound2, bound2)
    return (w1, b1, w2, b2)


if __name__ == "__main__":
    key = jax.random.PRNGKey(0)
    num_nodes = 16
    num_feats = 8
    hidden_channels = 32
    num_classes = 4
    num_edges = 40
    num_graphs = 2

    kx, ke, kp = jax.random.split(key, 3)
    x = jax.random.normal(kx, (num_nodes, num_feats), jnp.float32)
    edge_index = jax.random.randint(ke, (2, num_edges), 0, num_nodes, jnp.int32)
    batch = jnp.concatenate(
        [jnp.zeros(num_nodes // 2, jnp.int32), jnp.ones(num_nodes - num_nodes // 2, jnp.int32)]
    )
    params = init_params(kp, num_feats, hidden_channels, num_classes)

    fwd = jax.jit(gin_forward, static_argnames=("num_graphs", "tile"))
    out = fwd(x, edge_index, batch, params, num_graphs=num_graphs)
    jax.block_until_ready(out)
    assert out.shape == (num_graphs, num_classes)

    # --- References ---------------------------------------------------------
    w1, b1, w2, b2 = params
    src, dst = edge_index[0], edge_index[1]
    adj = (jnp.zeros((num_nodes, num_nodes), jnp.float32).at[dst, src].add(1.0)
           + (1.0 + EPS) * jnp.eye(num_nodes, dtype=jnp.float32))
    onehot = (batch[None, :] == jnp.arange(num_graphs)[:, None]).astype(jnp.float32)
    pool = onehot / jnp.maximum(onehot.sum(1, keepdims=True), 1.0)

    def bf16_round(v):
        return v.astype(jnp.bfloat16).astype(jnp.float32)

    # (a) precision-mirrored reference (bf16 operands only on the aggregation
    #     matmuls, f32 everywhere else — same as the kernel path).
    h1_q = jnp.maximum((adj @ bf16_round(x)) @ w1 + b1, 0.0)
    h2_q = (adj @ bf16_round(h1_q)) @ w2 + b2
    ref_q = pool @ h2_q
    assert jnp.allclose(out, ref_q, atol=2e-3, rtol=2e-3), (out, ref_q)

    # (b) pure-f32 PyTorch-semantics reference (sanity check).
    h1_f = jnp.maximum((adj @ x) @ w1 + b1, 0.0)
    h2_f = (adj @ h1_f) @ w2 + b2
    ref_f = pool @ h2_f
    assert jnp.allclose(out, ref_f, atol=5e-2, rtol=5e-2), (out, ref_f)

    print("KERNEL_OK")
</pallas_src>

<mosaic_0001>
module attributes {stable_mosaic.version = 11 : i64} {
  func.func @gin_conv_kernel(%arg0: i32, %arg1: i32, %arg2: memref<128x128xi8, #tpu.memory_space<vmem>>, %arg3: memref<128x128xf32, #tpu.memory_space<vmem>>, %arg4: memref<128x128xf32, #tpu.memory_space<vmem>>, %arg5: memref<1x128xf32, #tpu.memory_space<vmem>>, %arg6: memref<128x128xf32, #tpu.memory_space<vmem>>, %arg7: memref<128x128xf32, #tpu.memory_space<vmem>>) attributes {dimension_semantics = [#tpu.dimension_semantics<parallel>, #tpu.dimension_semantics<arbitrary>], iteration_bounds = array<i64: 1, 1>, scalar_prefetch = 0 : i64, scratch_operands = 1 : i64, tpu.core_type = #tpu.core_type<tc>, window_params = [{transform_indices = @transform_0, window_bounds = array<i64: 128, 128>}, {pipeline_mode = #tpu.pipeline_mode<synchronous>, transform_indices = @transform_1, window_bounds = array<i64: 128, 128>}, {pipeline_mode = #tpu.pipeline_mode<synchronous>, transform_indices = @transform_2, window_bounds = array<i64: 128, 128>}, {pipeline_mode = #tpu.pipeline_mode<synchronous>, transform_indices = @transform_3, window_bounds = array<i64: 1, 128>}, {transform_indices = @transform_4, window_bounds = array<i64: 128, 128>}]} {
    %c0_i32 = arith.constant 0 : i32
    %0 = arith.cmpi eq, %arg1, %c0_i32 : i32
    %1 = arith.extui %0 : i1 to i32
    %c0_i32_0 = arith.constant 0 : i32
    %2 = arith.cmpi ne, %1, %c0_i32_0 : i32
    scf.if %2 {
      %cst_9 = arith.constant 0.000000e+00 : f32
      %17 = vector.broadcast %cst_9 : f32 to vector<128x128xf32>
      %c0_10 = arith.constant 0 : index
      %c0_11 = arith.constant 0 : index
      %18 = vector.load %arg7[%c0_10, %c0_11] : memref<128x128xf32, #tpu.memory_space<vmem>>, vector<128x128xf32>
      tpu.vector_store %arg7[%c0_10, %c0_11], %17 {strides = array<i32>} : memref<128x128xf32, #tpu.memory_space<vmem>>, vector<128x128xf32>,
    } else {
    }
    %c0 = arith.constant 0 : index
    %c0_1 = arith.constant 0 : index
    %3 = vector.load %arg2[%c0, %c0_1] : memref<128x128xi8, #tpu.memory_space<vmem>>, vector<128x128xi8>
    %4 = arith.sitofp %3 : vector<128x128xi8> to vector<128x128xbf16>
    %c128_i32 = arith.constant 128 : i32
    %5 = arith.muli %arg1, %c128_i32 : i32
    %6 = tpu.assume_multiple %5, 128 : i32
    %7 = arith.index_cast %6 : i32 to index
    %c0_2 = arith.constant 0 : index
    %8 = vector.load %arg3[%7, %c0_2] : memref<128x128xf32, #tpu.memory_space<vmem>>, vector<128x128xf32>
    %9 = arith.truncf %8 : vector<128x128xf32> to vector<128x128xbf16>
    %c0_3 = arith.constant 0 : index
    %c0_4 = arith.constant 0 : index
    %10 = vector.load %arg7[%c0_3, %c0_4] : memref<128x128xf32, #tpu.memory_space<vmem>>, vector<128x128xf32>
    %cst = arith.constant dense<0.000000e+00> : vector<128x128xf32>
    %11 = tpu.matmul %4, %9, %cst {dimension_numbers = #tpu.dot_dimension_numbers<[1], [0], [0], [1], [0, 0, 1, 1], [], []>} : vector<128x128xbf16>, vector<128x128xbf16>, vector<128x128xf32> -> vector<128x128xf32>
    %12 = arith.addf %10, %11 : vector<128x128xf32>
    %c0_5 = arith.constant 0 : index
    %c0_6 = arith.constant 0 : index
    %13 = vector.load %arg7[%c0_5, %c0_6] : memref<128x128xf32, #tpu.memory_space<vmem>>, vector<128x128xf32>
    tpu.vector_store %arg7[%c0_5, %c0_6], %12 {strides = array<i32>} : memref<128x128xf32, #tpu.memory_space<vmem>>, vector<128x128xf32>,
    %c0_i32_7 = arith.constant 0 : i32
    %14 = arith.cmpi eq, %arg1, %c0_i32_7 : i32
    %15 = arith.extui %14 : i1 to i32
    %c0_i32_8 = arith.constant 0 : i32
    %16 = arith.cmpi ne, %15, %c0_i32_8 : i32
    scf.if %16 {
      %c0_9 = arith.constant 0 : index
      %c0_10 = arith.constant 0 : index
      %17 = vector.load %arg7[%c0_9, %c0_10] : memref<128x128xf32, #tpu.memory_space<vmem>>, vector<128x128xf32>
      %c0_11 = arith.constant 0 : index
      %c0_12 = arith.constant 0 : index
      %18 = vector.load %arg4[%c0_11, %c0_12] : memref<128x128xf32, #tpu.memory_space<vmem>>, vector<128x128xf32>
      %cst_13 = arith.constant dense<0.000000e+00> : vector<128x128xf32>
      %19 = tpu.matmul %17, %18, %cst_13 {dimension_numbers = #tpu.dot_dimension_numbers<[1], [0], [0], [1], [0, 0, 1, 1], [], []>} : vector<128x128xf32>, vector<128x128xf32>, vector<128x128xf32> -> vector<128x128xf32>
      %c0_14 = arith.constant 0 : index
      %c0_15 = arith.constant 0 : index
      %20 = vector.load %arg5[%c0_14, %c0_15] : memref<1x128xf32, #tpu.memory_space<vmem>>, vector<1x128xf32>
      %21 = vector.broadcast %20 : vector<1x128xf32> to vector<128x128xf32>
      %22 = arith.addf %19, %21 : vector<128x128xf32>
      %cst_16 = arith.constant 0.000000e+00 : f32
      %23 = vector.broadcast %cst_16 : f32 to vector<128x128xf32>
      %24 = arith.maximumf %22, %23 : vector<128x128xf32>
      %c0_17 = arith.constant 0 : index
      %c0_18 = arith.constant 0 : index
      %25 = vector.load %arg6[%c0_17, %c0_18] : memref<128x128xf32, #tpu.memory_space<vmem>>, vector<128x128xf32>
      tpu.vector_store %arg6[%c0_17, %c0_18], %24 {strides = array<i32>} : memref<128x128xf32, #tpu.memory_space<vmem>>, vector<128x128xf32>,
    } else {
    }
    return
  }
  func.func @transform_0(%arg0: i32, %arg1: i32) -> (i32, i32) {
    %c0_i32 = arith.constant 0 : i32
    return %arg0, %arg1 : i32, i32
  }
  func.func @transform_1(%arg0: i32, %arg1: i32) -> (i32, i32) {
    %c0_i32 = arith.constant 0 : i32
    %c0_i32_0 = arith.constant 0 : i32
    %c0_i32_1 = arith.constant 0 : i32
    return %c0_i32, %c0_i32_0 : i32, i32
  }
  func.func @transform_2(%arg0: i32, %arg1: i32) -> (i32, i32) {
    %c0_i32 = arith.constant 0 : i32
    %c0_i32_0 = arith.constant 0 : i32
    %c0_i32_1 = arith.constant 0 : i32
    return %c0_i32, %c0_i32_0 : i32, i32
  }
  func.func @transform_3(%arg0: i32, %arg1: i32) -> (i32, i32) {
    %c0_i32 = arith.constant 0 : i32
    %c0_i32_0 = arith.constant 0 : i32
    %c0_i32_1 = arith.constant 0 : i32
    return %c0_i32, %c0_i32_0 : i32, i32
  }
  func.func @transform_4(%arg0: i32, %arg1: i32) -> (i32, i32) {
    %c0_i32 = arith.constant 0 : i32
    %c0_i32_0 = arith.constant 0 : i32
    return %arg0, %c0_i32 : i32, i32
  }
}

module attributes {stable_mosaic.version = 11 : i64} {
  func.func @gin_conv_kernel(%arg0: i32, %arg1: i32, %arg2: memref<128x128xi8, #tpu.memory_space<vmem>>, %arg3: memref<128x128xf32, #tpu.memory_space<vmem>>, %arg4: memref<128x128xf32, #tpu.memory_space<vmem>>, %arg5: memref<1x128xf32, #tpu.memory_space<vmem>>, %arg6: memref<128x128xf32, #tpu.memory_space<vmem>>, %arg7: memref<128x128xf32, #tpu.memory_space<vmem>>) attributes {dimension_semantics = [#tpu.dimension_semantics<parallel>, #tpu.dimension_semantics<arbitrary>], iteration_bounds = array<i64: 1, 1>, scalar_prefetch = 0 : i64, scratch_operands = 1 : i64, tpu.core_type = #tpu.core_type<tc>, window_params = [{transform_indices = @transform_0, window_bounds = array<i64: 128, 128>}, {pipeline_mode = #tpu.pipeline_mode<synchronous>, transform_indices = @transform_1, window_bounds = array<i64: 128, 128>}, {pipeline_mode = #tpu.pipeline_mode<synchronous>, transform_indices = @transform_2, window_bounds = array<i64: 128, 128>}, {pipeline_mode = #tpu.pipeline_mode<synchronous>, transform_indices = @transform_3, window_bounds = array<i64: 1, 128>}, {transform_indices = @transform_4, window_bounds = array<i64: 128, 128>}]} {
    %c0_i32 = arith.constant 0 : i32
    %0 = arith.cmpi eq, %arg1, %c0_i32 : i32
    %1 = arith.extui %0 : i1 to i32
    %c0_i32_0 = arith.constant 0 : i32
    %2 = arith.cmpi ne, %1, %c0_i32_0 : i32
    scf.if %2 {
      %cst_9 = arith.constant 0.000000e+00 : f32
      %17 = vector.broadcast %cst_9 : f32 to vector<128x128xf32>
      %c0_10 = arith.constant 0 : index
      %c0_11 = arith.constant 0 : index
      %18 = vector.load %arg7[%c0_10, %c0_11] : memref<128x128xf32, #tpu.memory_space<vmem>>, vector<128x128xf32>
      tpu.vector_store %arg7[%c0_10, %c0_11], %17 {strides = array<i32>} : memref<128x128xf32, #tpu.memory_space<vmem>>, vector<128x128xf32>,
    } else {
    }
    %c0 = arith.constant 0 : index
    %c0_1 = arith.constant 0 : index
    %3 = vector.load %arg2[%c0, %c0_1] : memref<128x128xi8, #tpu.memory_space<vmem>>, vector<128x128xi8>
    %4 = arith.sitofp %3 : vector<128x128xi8> to vector<128x128xbf16>
    %c128_i32 = arith.constant 128 : i32
    %5 = arith.muli %arg1, %c128_i32 : i32
    %6 = tpu.assume_multiple %5, 128 : i32
    %7 = arith.index_cast %6 : i32 to index
    %c0_2 = arith.constant 0 : index
    %8 = vector.load %arg3[%7, %c0_2] : memref<128x128xf32, #tpu.memory_space<vmem>>, vector<128x128xf32>
    %9 = arith.truncf %8 : vector<128x128xf32> to vector<128x128xbf16>
    %c0_3 = arith.constant 0 : index
    %c0_4 = arith.constant 0 : index
    %10 = vector.load %arg7[%c0_3, %c0_4] : memref<128x128xf32, #tpu.memory_space<vmem>>, vector<128x128xf32>
    %cst = arith.constant dense<0.000000e+00> : vector<128x128xf32>
    %11 = tpu.matmul %4, %9, %cst {dimension_numbers = #tpu.dot_dimension_numbers<[1], [0], [0], [1], [0, 0, 1, 1], [], []>} : vector<128x128xbf16>, vector<128x128xbf16>, vector<128x128xf32> -> vector<128x128xf32>
    %12 = arith.addf %10, %11 : vector<128x128xf32>
    %c0_5 = arith.constant 0 : index
    %c0_6 = arith.constant 0 : index
    %13 = vector.load %arg7[%c0_5, %c0_6] : memref<128x128xf32, #tpu.memory_space<vmem>>, vector<128x128xf32>
    tpu.vector_store %arg7[%c0_5, %c0_6], %12 {strides = array<i32>} : memref<128x128xf32, #tpu.memory_space<vmem>>, vector<128x128xf32>,
    %c0_i32_7 = arith.constant 0 : i32
    %14 = arith.cmpi eq, %arg1, %c0_i32_7 : i32
    %15 = arith.extui %14 : i1 to i32
    %c0_i32_8 = arith.constant 0 : i32
    %16 = arith.cmpi ne, %15, %c0_i32_8 : i32
    scf.if %16 {
      %c0_9 = arith.constant 0 : index
      %c0_10 = arith.constant 0 : index
      %17 = vector.load %arg7[%c0_9, %c0_10] : memref<128x128xf32, #tpu.memory_space<vmem>>, vector<128x128xf32>
      %c0_11 = arith.constant 0 : index
      %c0_12 = arith.constant 0 : index
      %18 = vector.load %arg4[%c0_11, %c0_12] : memref<128x128xf32, #tpu.memory_space<vmem>>, vector<128x128xf32>
      %cst_13 = arith.constant dense<0.000000e+00> : vector<128x128xf32>
      %19 = tpu.matmul %17, %18, %cst_13 {dimension_numbers = #tpu.dot_dimension_numbers<[1], [0], [0], [1], [0, 0, 1, 1], [], []>} : vector<128x128xf32>, vector<128x128xf32>, vector<128x128xf32> -> vector<128x128xf32>
      %c0_14 = arith.constant 0 : index
      %c0_15 = arith.constant 0 : index
      %20 = vector.load %arg5[%c0_14, %c0_15] : memref<1x128xf32, #tpu.memory_space<vmem>>, vector<1x128xf32>
      %21 = vector.broadcast %20 : vector<1x128xf32> to vector<128x128xf32>
      %22 = arith.addf %19, %21 : vector<128x128xf32>
      %c0_16 = arith.constant 0 : index
      %c0_17 = arith.constant 0 : index
      %23 = vector.load %arg6[%c0_16, %c0_17] : memref<128x128xf32, #tpu.memory_space<vmem>>, vector<128x128xf32>
      tpu.vector_store %arg6[%c0_16, %c0_17], %22 {strides = array<i32>} : memref<128x128xf32, #tpu.memory_space<vmem>>, vector<128x128xf32>,
    } else {
    }
    return
  }
  func.func @transform_0(%arg0: i32, %arg1: i32) -> (i32, i32) {
    %c0_i32 = arith.constant 0 : i32
    return %arg0, %arg1 : i32, i32
  }
  func.func @transform_1(%arg0: i32, %arg1: i32) -> (i32, i32) {
    %c0_i32 = arith.constant 0 : i32
    %c0_i32_0 = arith.constant 0 : i32
    %c0_i32_1 = arith.constant 0 : i32
    return %c0_i32, %c0_i32_0 : i32, i32
  }
  func.func @transform_2(%arg0: i32, %arg1: i32) -> (i32, i32) {
    %c0_i32 = arith.constant 0 : i32
    %c0_i32_0 = arith.constant 0 : i32
    %c0_i32_1 = arith.constant 0 : i32
    return %c0_i32, %c0_i32_0 : i32, i32
  }
  func.func @transform_3(%arg0: i32, %arg1: i32) -> (i32, i32) {
    %c0_i32 = arith.constant 0 : i32
    %c0_i32_0 = arith.constant 0 : i32
    %c0_i32_1 = arith.constant 0 : i32
    return %c0_i32, %c0_i32_0 : i32, i32
  }
  func.func @transform_4(%arg0: i32, %arg1: i32) -> (i32, i32) {
    %c0_i32 = arith.constant 0 : i32
    %c0_i32_0 = arith.constant 0 : i32
    return %arg0, %c0_i32 : i32, i32
  }
}

module attributes {stable_mosaic.version = 11 : i64} {
  func.func @mean_pool_kernel(%arg0: i32, %arg1: memref<2x128xf32, #tpu.memory_space<vmem>>, %arg2: memref<128x128xf32, #tpu.memory_space<vmem>>, %arg3: memref<2x128xf32, #tpu.memory_space<vmem>>) attributes {dimension_semantics = [#tpu.dimension_semantics<arbitrary>], iteration_bounds = array<i64: 1>, scalar_prefetch = 0 : i64, scratch_operands = 0 : i64, tpu.core_type = #tpu.core_type<tc>, window_params = [{transform_indices = @transform_0, window_bounds = array<i64: 2, 128>}, {transform_indices = @transform_1, window_bounds = array<i64: 128, 128>}, {pipeline_mode = #tpu.pipeline_mode<synchronous>, transform_indices = @transform_2, window_bounds = array<i64: 2, 128>}]} {
    %c0_i32 = arith.constant 0 : i32
    %0 = arith.cmpi eq, %arg0, %c0_i32 : i32
    %1 = arith.extui %0 : i1 to i32
    %c0_i32_0 = arith.constant 0 : i32
    %2 = arith.cmpi ne, %1, %c0_i32_0 : i32
    scf.if %2 {
      %cst_8 = arith.constant 0.000000e+00 : f32
      %9 = vector.broadcast %cst_8 : f32 to vector<2x128xf32>
      %c0_9 = arith.constant 0 : index
      %c0_10 = arith.constant 0 : index
      %10 = vector.load %arg3[%c0_9, %c0_10] : memref<2x128xf32, #tpu.memory_space<vmem>>, vector<2x128xf32>
      tpu.vector_store %arg3[%c0_9, %c0_10], %9 {strides = array<i32>} : memref<2x128xf32, #tpu.memory_space<vmem>>, vector<2x128xf32>,
    } else {
    }
    %c0 = arith.constant 0 : index
    %c0_1 = arith.constant 0 : index
    %3 = vector.load %arg3[%c0, %c0_1] : memref<2x128xf32, #tpu.memory_space<vmem>>, vector<2x128xf32>
    %c0_2 = arith.constant 0 : index
    %c0_3 = arith.constant 0 : index
    %4 = vector.load %arg1[%c0_2, %c0_3] : memref<2x128xf32, #tpu.memory_space<vmem>>, vector<2x128xf32>
    %c0_4 = arith.constant 0 : index
    %c0_5 = arith.constant 0 : index
    %5 = vector.load %arg2[%c0_4, %c0_5] : memref<128x128xf32, #tpu.memory_space<vmem>>, vector<128x128xf32>
    %cst = arith.constant dense<0.000000e+00> : vector<2x128xf32>
    %6 = tpu.matmul %4, %5, %cst {dimension_numbers = #tpu.dot_dimension_numbers<[1], [0], [0], [1], [0, 0, 1, 1], [], []>} : vector<2x128xf32>, vector<128x128xf32>, vector<2x128xf32> -> vector<2x128xf32>
    %7 = arith.addf %3, %6 : vector<2x128xf32>
    %c0_6 = arith.constant 0 : index
    %c0_7 = arith.constant 0 : index
    %8 = vector.load %arg3[%c0_6, %c0_7] : memref<2x128xf32, #tpu.memory_space<vmem>>, vector<2x128xf32>
    tpu.vector_store %arg3[%c0_6, %c0_7], %7 {strides = array<i32>} : memref<2x128xf32, #tpu.memory_space<vmem>>, vector<2x128xf32>,
    return
  }
  func.func @transform_0(%arg0: i32) -> (i32, i32) {
    %c0_i32 = arith.constant 0 : i32
    %c0_i32_0 = arith.constant 0 : i32
    return %c0_i32, %arg0 : i32, i32
  }
  func.func @transform_1(%arg0: i32) -> (i32, i32) {
    %c0_i32 = arith.constant 0 : i32
    %c0_i32_0 = arith.constant 0 : i32
    return %arg0, %c0_i32 : i32, i32
  }
  func.func @transform_2(%arg0: i32) -> (i32, i32) {
    %c0_i32 = arith.constant 0 : i32
    %c0_i32_0 = arith.constant 0 : i32
    %c0_i32_1 = arith.constant 0 : i32
    return %c0_i32, %c0_i32_0 : i32, i32
  }
}

</mosaic_0001>

<bundles_post_ra>
// kernel: gin_forward.3
= control target key start
LH: loop header
LB: loop body
LE: loop exit
PB: predicated region body
PF: predicated region fallthrough
CT: control target
= control target key end

     0   :  { %s909_s1 = inlined_call_operand.vmem [shape: f32[128,128], index: 1, kind: input, shape index: {}]   ;;  %s910_s0 = inlined_call_operand.vmem [shape: s8[128,128], index: 0, kind: input, shape index: {}]   ;;  %s911_s2 = inlined_call_operand.vmem [shape: f32[128,128], index: 2, kind: input, shape index: {}]   ;;  %s912_s3 = inlined_call_operand.vmem [shape: f32[1,128], index: 3, kind: input, shape index: {}]   ;;  %s913_s4 = inlined_call_operand.vmem [shape: f32[128,128], index: 4, kind: output, shape index: {}]  }
   0x1   :  { %v72_v0 = vld [vmem:[%s909_s1] sm:$0xff]  ;;  %v73_v1 = vld [vmem:[%s909_s1 + $0x8] sm:$0xff]  ;;  %v74_v2 = vld [vmem:[%s909_s1 + $0x10] sm:$0xff] }
   0x2   :  { %v88_v3 = vpack.c.bf16 %v73_v1, %v72_v0  ;;  %v75_v4 = vld [vmem:[%s909_s1 + $0x18] sm:$0xff]  ;;  %v76_v6 = vld [vmem:[%s909_s1 + $0x20] sm:$0xff]  ;;  %v77_v7 = vld [vmem:[%s909_s1 + $0x28] sm:$0xff] }
   0x3   :  { %v89_v5 = vpack.c.bf16 %v75_v4, %v74_v2  ;;  %v90_v8 = vpack.c.bf16 %v77_v7, %v76_v6  ;;  %v38_v9 = vld [vmem:[%s910_s0] sm:$0x3]  ;;  %v39_v10 = vld [vmem:[%s910_s0 + $0x2] sm:$0x3]  ;;  %v78_v11 = vld [vmem:[%s909_s1 + $0x30] sm:$0xff] }
   0x4   :  { %569 = vmatprep.subr.bf16.mxu0 %v88_v3  ;;  %v79_v12 = vld [vmem:[%s909_s1 + $0x38] sm:$0xff]  ;;  %v54_v13 = vunpack.c.l.s8.bf16 %v38_v9  ;;  %v55_v14 = vunpack.c.l.s8.bf16 %v39_v10  ;;  %v80_v17 = vld [vmem:[%s909_s1 + $0x40] sm:$0xff]  ;;  %v81_v18 = vld [vmem:[%s909_s1 + $0x48] sm:$0xff] }
   0x5   :  { %570 = vmatpush3.bf16.msra.mxu0 %v88_v3  ;;  %v91_v16 = vpack.c.bf16 %v79_v12, %v78_v11  ;;  %v308_v19 = vld [vmem:[%s911_s2] sm:$0xff]  ;;  %v309_v20 = vld [vmem:[%s911_s2 + $0x8] sm:$0xff]  ;;  %v310_v21 = vld [vmem:[%s911_s2 + $0x10] sm:$0xff]  ;;  %v92_v25 = vpack.c.bf16 %v81_v18, %v80_v17 }
   0x6   :  { %571 = vmatprep.subr.bf16.mxu0 %v89_v5  ;;  %v512_v15 = vcombine.low %v54_v13, %v55_v14  ;;  %v311_v22 = vld [vmem:[%s911_s2 + $0x18] sm:$0xff]  ;;  %v657_v23 = vpack.c.bf16 %v309_v20, %v308_v19  ;;  %v312_v26 = vld [vmem:[%s911_s2 + $0x20] sm:$0xff]  ;;  %v313_v27 = vld [vmem:[%s911_s2 + $0x28] sm:$0xff] }
   0x7   :  { %v661_v24 = vpack.c.bf16 %v311_v22, %v310_v21  ;;  %v82_v28 = vld [vmem:[%s909_s1 + $0x50] sm:$0xff]  ;;  %v83_v29 = vld [vmem:[%s909_s1 + $0x58] sm:$0xff]  ;;  %v665_v30 = vpack.c.bf16 %v313_v27, %v312_v26  ;;  %v84_v34 = vld [vmem:[%s909_s1 + $0x60] sm:$0xff] }
   0x8   :  { %585 = vmatprep.mubr.bf16.mxu0 %v512_v15  ;;  %658 = vmatprep.subr.bf16.mxu1 %v657_v23  ;;  %v93_v31 = vpack.c.bf16 %v83_v29, %v82_v28  ;;  %v314_v32 = vld [vmem:[%s911_s2 + $0x30] sm:$0xff]  ;;  %v315_v33 = vld [vmem:[%s911_s2 + $0x38] sm:$0xff]  ;;  %v85_v35 = vld [vmem:[%s909_s1 + $0x68] sm:$0xff] }
   0x9   :  { %572 = vmatpush3.bf16.msra.mxu0 %v89_v5  ;;  %660 = vmatpush3.bf16.msra.mxu1 %v657_v23  ;;  %v669_v36 = vpack.c.bf16 %v315_v33, %v314_v32  ;;  %v94_v37 = vpack.c.bf16 %v85_v35, %v84_v34  ;;  %v316_v38 = vld [vmem:[%s911_s2 + $0x40] sm:$0xff]  ;;  %v317_v39 = vld [vmem:[%s911_s2 + $0x48] sm:$0xff]  ;;  %v86_v40 = vld [vmem:[%s909_s1 + $0x70] sm:$0xff] }
   0xa   :  { %573 = vmatprep.subr.bf16.mxu0 %v90_v8  ;;  %662 = vmatprep.subr.bf16.mxu1 %v661_v24  ;;  %v87_v41 = vld [vmem:[%s909_s1 + $0x78] sm:$0xff]  ;;  %v40_v42 = vld [vmem:[%s910_s0 + $0x4] sm:$0x3]  ;;  %v41_v43 = vld [vmem:[%s910_s0 + $0x6] sm:$0x3]  ;;  %v673_v45 = vpack.c.bf16 %v317_v39, %v316_v38 }
   0xb   :  { %v42_v44 = vld [vmem:[%s910_s0 + $0x8] sm:$0x3]  ;;  %v95_v46 = vpack.c.bf16 %v87_v41, %v86_v40  ;;  %v43_v47 = vld [vmem:[%s910_s0 + $0xa] sm:$0x3]  ;;  %v318_v48 = vld [vmem:[%s911_s2 + $0x50] sm:$0xff]  ;;  %v56_v50 = vunpack.c.l.s8.bf16 %v40_v42  ;;  %v57_v51 = vunpack.c.l.s8.bf16 %v41_v43 }
   0xc   :  { %v319_v49 = vld [vmem:[%s911_s2 + $0x58] sm:$0xff]  ;;  %v58_v52 = vunpack.c.l.s8.bf16 %v42_v44  ;;  %v59_v53 = vunpack.c.l.s8.bf16 %v43_v47  ;;  %v320_v55 = vld [vmem:[%s911_s2 + $0x60] sm:$0xff]  ;;  %v321_v56 = vld [vmem:[%s911_s2 + $0x68] sm:$0xff] }
   0xd   :  { %574 = vmatpush3.bf16.msra.mxu0 %v90_v8  ;;  %664 = vmatpush3.bf16.msra.mxu1 %v661_v24  ;;  %v677_v54 = vpack.c.bf16 %v319_v49, %v318_v48  ;;  %v513_v57 = vcombine.low %v56_v50, %v57_v51  ;;  %v44_v59 = vld [vmem:[%s910_s0 + $0xc] sm:$0x3]  ;;  %v45_v60 = vld [vmem:[%s910_s0 + $0xe] sm:$0x3]  ;;  %v681_v61 = vpack.c.bf16 %v321_v56, %v320_v55  ;;  %v46_v62 = vld [vmem:[%s910_s0 + $0x10] sm:$0x3] }
   0xe   :  { %575 = vmatprep.subr.bf16.mxu0 %v91_v16  ;;  %666 = vmatprep.subr.bf16.mxu1 %v665_v30  ;;  %v514_v58 = vcombine.low %v58_v52, %v59_v53  ;;  %v47_v63 = vld [vmem:[%s910_s0 + $0x12] sm:$0x3]  ;;  %v60_v0 = vunpack.c.l.s8.bf16 %v44_v59  ;;  %v61_v1 = vunpack.c.l.s8.bf16 %v45_v60  ;;  %v62_v2 = vunpack.c.l.s8.bf16 %v46_v62  ;;  %v48_v6 = vld [vmem:[%s910_s0 + $0x14] sm:$0x3]  ;;  %v49_v7 = vld [vmem:[%s910_s0 + $0x16] sm:$0x3] }
   0xf   :  { %v63_v3 = vunpack.c.l.s8.bf16 %v47_v63  ;;  %v50_v8 = vld [vmem:[%s910_s0 + $0x18] sm:$0x3]  ;;  %v51_v9 = vld [vmem:[%s910_s0 + $0x1a] sm:$0x3]  ;;  %v64_v10 = vunpack.c.l.s8.bf16 %v48_v6  ;;  %v65_v11 = vunpack.c.l.s8.bf16 %v49_v7  ;;  %v53_v17 = vld [vmem:[%s910_s0 + $0x1e] sm:$0x3] }
  0x10   :  { %v515_v4 = vcombine.low %v60_v0, %v61_v1  ;;  %v66_v12 = vunpack.c.l.s8.bf16 %v50_v8  ;;  %v67_v13 = vunpack.c.l.s8.bf16 %v51_v9  ;;  %v69_v19 = vunpack.c.l.s8.bf16 %v53_v17  ;;  %v322_v21 = vld [vmem:[%s911_s2 + $0x70] sm:$0xff]  ;;  %v323_v22 = vld [vmem:[%s911_s2 + $0x78] sm:$0xff]  ;;  %v520_v40 = vld [vmem:[%s912_s3] ss:$0 sm:$0xff] }
  0x11   :  { %576 = vmatpush3.bf16.msra.mxu0 %v91_v16  ;;  %668 = vmatpush3.bf16.msra.mxu1 %v665_v30  ;;  %v516_v5 = vcombine.low %v62_v2, %v63_v3  ;;  %v517_v14 = vcombine.low %v64_v10, %v65_v11  ;;  %v52_v16 = vld [vmem:[%s910_s0 + $0x1c] sm:$0x3]  ;;  %v685_v23 = vpack.c.bf16 %v323_v22, %v322_v21 }
  0x12   :  { %577 = vmatprep.subr.bf16.mxu0 %v92_v25  ;;  %670 = vmatprep.subr.bf16.mxu1 %v669_v36  ;;  %v518_v15 = vcombine.low %v66_v12, %v67_v13  ;;  %v68_v18 = vunpack.c.l.s8.bf16 %v52_v16 }
  0x14   :  { %v519_v20 = vcombine.low %v68_v18, %v69_v19 }
  0x15   :  { %578 = vmatpush3.bf16.msra.mxu0 %v92_v25  ;;  %672 = vmatpush3.bf16.msra.mxu1 %v669_v36 }
  0x16   :  { %579 = vmatprep.subr.bf16.mxu0 %v93_v31  ;;  %674 = vmatprep.subr.bf16.mxu1 %v673_v45 }
  0x19   :  { %580 = vmatpush3.bf16.msra.mxu0 %v93_v31  ;;  %676 = vmatpush3.bf16.msra.mxu1 %v673_v45 }
  0x1a   :  { %581 = vmatprep.subr.bf16.mxu0 %v94_v37  ;;  %678 = vmatprep.subr.bf16.mxu1 %v677_v54 }
  0x1d   :  { %582 = vmatpush3.bf16.msra.mxu0 %v94_v37  ;;  %680 = vmatpush3.bf16.msra.mxu1 %v677_v54 }
  0x1e   :  { %583 = vmatprep.subr.bf16.mxu0 %v95_v46  ;;  %682 = vmatprep.subr.bf16.mxu1 %v681_v61 }
  0x21   :  { %584 = vmatpush3.bf16.msra.mxu0 %v95_v46  ;;  %684 = vmatpush3.bf16.msra.mxu1 %v681_v61 }
  0x22   :  { %686 = vmatprep.subr.bf16.mxu1 %v685_v23 }
  0x24   :  { %586 = vmatmul.mubr.bf16.vlgmr.msra.gmra.mrb[0].mxu0 %v513_v57 }
  0x25   :  { %589 = vmatprep.mubr.bf16.mxu0 %v514_v58  ;;  %688 = vmatpush3.bf16.msra.mxu1 %v685_v23 }
  0x2c   :  { %590 = vmatmul.mubr.bf16.gmra.mrb[4].mxu0 %v515_v4 }
  0x2d   :  { %593 = vmatprep.mubr.bf16.mxu0 %v516_v5 }
  0x34   :  { %594 = vmatmul.mubr.bf16.gmra.mrb[8].mxu0 %v517_v14 }
  0x35   :  { %597 = vmatprep.mubr.bf16.mxu0 %v518_v15 }
  0x3c   :  { %598 = vmatmul.mubr.bf16.gmra.mrb[12].mxu0 %v519_v20 }
  0xf7   :  { %v587_v24 = vpop.f32.mrb[0].mxu0 }
  0xf8   :  { %v194_v25 = vpop.f32.mrb[1].mxu0 }
  0xf9   :  { %v588_v26 = vpop.f32.mrb[2].mxu0  ;;  %633 = vmatprep.mubr.f32.mxu1 %v194_v25 }
  0xfa   :  { %v197_v27 = vpop.f32.mrb[3].mxu0 }
  0xfb   :  { %634 = vmatmul.mubr.f32.vlgmr.msra.gmra.mrb[0].mxu1 %v197_v27 }
  0xfc   :  { %636 = vmatprep.mubr.f32.mxu1 %v587_v24 }
  0xff   :  { %v591_v28 = vpop.f32.mrb[4].mxu0  ;;  %637 = vmatmul.mubr.f32.gmra.mrb[2].mxu1 %v588_v26 }
 0x100   :  { %v210_v29 = vpop.f32.mrb[5].mxu0 }
 0x101   :  { %v592_v30 = vpop.f32.mrb[6].mxu0  ;;  %639 = vmatprep.mubr.f32.mxu1 %v210_v29 }
 0x102   :  { %v213_v31 = vpop.f32.mrb[7].mxu0 }
 0x103   :  { %640 = vmatmul.mubr.f32.gmra.mrb[4].mxu1 %v213_v31 }
 0x104   :  { %642 = vmatprep.mubr.f32.mxu1 %v591_v28 }
 0x107   :  { %v595_v32 = vpop.f32.mrb[8].mxu0  ;;  %643 = vmatmul.mubr.f32.gmra.mrb[6].mxu1 %v592_v30 }
 0x108   :  { %v226_v33 = vpop.f32.mrb[9].mxu0 }
 0x109   :  { %v596_v34 = vpop.f32.mrb[10].mxu0  ;;  %645 = vmatprep.mubr.f32.mxu1 %v226_v33 }
 0x10a   :  { %v229_v35 = vpop.f32.mrb[11].mxu0 }
 0x10b   :  { %646 = vmatmul.mubr.f32.gmra.mrb[8].mxu1 %v229_v35 }
 0x10c   :  { %648 = vmatprep.mubr.f32.mxu1 %v595_v32 }
 0x10f   :  { %v599_v36 = vpop.f32.mrb[12].mxu0  ;;  %649 = vmatmul.mubr.f32.gmra.mrb[10].mxu1 %v596_v34 }
 0x110   :  { %v242_v37 = vpop.f32.mrb[13].mxu0 }
 0x111   :  { %v600_v38 = vpop.f32.mrb[14].mxu0  ;;  %651 = vmatprep.mubr.f32.mxu1 %v242_v37 }
 0x112   :  { %v245_v39 = vpop.f32.mrb[15].mxu0 }
 0x113   :  { %652 = vmatmul.mubr.f32.gmra.mrb[12].mxu1 %v245_v39 }
 0x114   :  { %654 = vmatprep.mubr.f32.mxu1 %v599_v36 }
 0x117   :  { %655 = vmatmul.mubr.f32.gmra.mrb[14].mxu1 %v600_v38 }
 0x1ce   :  { %v635_v41 = vpop.f32.mrb[0].mxu1 }
 0x1cf   :  { %v403_v42 = vadd.f32 %v635_v41, %v520_v40  ;;  %v397_v43 = vpop.f32.mrb[1].mxu1 }
 0x1d0   :  { %v398_v44 = vadd.f32 %v520_v40, %v397_v43 }
 0x1d1   :  { %v477_v45 = vmax.f32 %v403_v42, 0.0 }
 0x1d2   :  { %v476_v46 = vmax.f32 %v398_v44, 0.0  ;;  %v638_v47 = vpop.f32.mrb[2].mxu1 }
 0x1d3   :  { %493 = vst [vmem:[%s913_s4 + $0x8] sm:$0xff] %v477_v45  ;;  %v413_v48 = vadd.f32 %v638_v47, %v520_v40  ;;  %v407_v49 = vpop.f32.mrb[3].mxu1 }
 0x1d4   :  { %492 = vst [vmem:[%s913_s4] sm:$0xff] %v476_v46  ;;  %v408_v50 = vadd.f32 %v520_v40, %v407_v49 }
 0x1d5   :  { %v479_v51 = vmax.f32 %v413_v48, 0.0 }
 0x1d6   :  { %v478_v52 = vmax.f32 %v408_v50, 0.0  ;;  %v641_v53 = vpop.f32.mrb[4].mxu1 }
 0x1d7   :  { %495 = vst [vmem:[%s913_s4 + $0x18] sm:$0xff] %v479_v51  ;;  %v423_v54 = vadd.f32 %v641_v53, %v520_v40  ;;  %v417_v55 = vpop.f32.mrb[5].mxu1 }
 0x1d8   :  { %494 = vst [vmem:[%s913_s4 + $0x10] sm:$0xff] %v478_v52  ;;  %v418_v56 = vadd.f32 %v520_v40, %v417_v55 }
 0x1d9   :  { %v481_v57 = vmax.f32 %v423_v54, 0.0 }
 0x1da   :  { %v480_v58 = vmax.f32 %v418_v56, 0.0  ;;  %v644_v59 = vpop.f32.mrb[6].mxu1 }
 0x1db   :  { %497 = vst [vmem:[%s913_s4 + $0x28] sm:$0xff] %v481_v57  ;;  %v433_v60 = vadd.f32 %v644_v59, %v520_v40  ;;  %v427_v61 = vpop.f32.mrb[7].mxu1 }
 0x1dc   :  { %496 = vst [vmem:[%s913_s4 + $0x20] sm:$0xff] %v480_v58  ;;  %v428_v62 = vadd.f32 %v520_v40, %v427_v61 }
 0x1dd   :  { %v483_v63 = vmax.f32 %v433_v60, 0.0 }
 0x1de   :  { %v482_v0 = vmax.f32 %v428_v62, 0.0  ;;  %v647_v1 = vpop.f32.mrb[8].mxu1 }
 0x1df   :  { %499 = vst [vmem:[%s913_s4 + $0x38] sm:$0xff] %v483_v63  ;;  %v443_v2 = vadd.f32 %v647_v1, %v520_v40  ;;  %v437_v3 = vpop.f32.mrb[9].mxu1 }
 0x1e0   :  { %498 = vst [vmem:[%s913_s4 + $0x30] sm:$0xff] %v482_v0  ;;  %v438_v4 = vadd.f32 %v520_v40, %v437_v3 }
 0x1e1   :  { %v485_v5 = vmax.f32 %v443_v2, 0.0 }
 0x1e2   :  { %v484_v6 = vmax.f32 %v438_v4, 0.0  ;;  %v650_v7 = vpop.f32.mrb[10].mxu1 }
 0x1e3   :  { %501 = vst [vmem:[%s913_s4 + $0x48] sm:$0xff] %v485_v5  ;;  %v453_v8 = vadd.f32 %v650_v7, %v520_v40  ;;  %v447_v9 = vpop.f32.mrb[11].mxu1 }
 0x1e4   :  { %500 = vst [vmem:[%s913_s4 + $0x40] sm:$0xff] %v484_v6  ;;  %v448_v10 = vadd.f32 %v520_v40, %v447_v9 }
 0x1e5   :  { %v487_v11 = vmax.f32 %v453_v8, 0.0 }
 0x1e6   :  { %v486_v12 = vmax.f32 %v448_v10, 0.0  ;;  %v653_v13 = vpop.f32.mrb[12].mxu1 }
 0x1e7   :  { %503 = vst [vmem:[%s913_s4 + $0x58] sm:$0xff] %v487_v11  ;;  %v463_v14 = vadd.f32 %v653_v13, %v520_v40  ;;  %v457_v15 = vpop.f32.mrb[13].mxu1 }
 0x1e8   :  { %502 = vst [vmem:[%s913_s4 + $0x50] sm:$0xff] %v486_v12  ;;  %v458_v16 = vadd.f32 %v520_v40, %v457_v15 }
 0x1e9   :  { %v489_v17 = vmax.f32 %v463_v14, 0.0 }
 0x1ea   :  { %v488_v18 = vmax.f32 %v458_v16, 0.0  ;;  %v656_v19 = vpop.f32.mrb[14].mxu1 }
 0x1eb   :  { %505 = vst [vmem:[%s913_s4 + $0x68] sm:$0xff] %v489_v17  ;;  %v473_v20 = vadd.f32 %v656_v19, %v520_v40  ;;  %v467_v21 = vpop.f32.mrb[15].mxu1 }
 0x1ec   :  { %504 = vst [vmem:[%s913_s4 + $0x60] sm:$0xff] %v488_v18  ;;  %v468_v22 = vadd.f32 %v520_v40, %v467_v21 }
 0x1ed   :  { %v491_v23 = vmax.f32 %v473_v20, 0.0 }
 0x1ee   :  { %v490_v24 = vmax.f32 %v468_v22, 0.0 }
 0x1ef   :  { %507 = vst [vmem:[%s913_s4 + $0x78] sm:$0xff] %v491_v23 }
 0x1f0   :  { %506 = vst [vmem:[%s913_s4 + $0x70] sm:$0xff] %v490_v24 }

// kernel: gin_forward.5
= control target key start
LH: loop header
LB: loop body
LE: loop exit
PB: predicated region body
PF: predicated region fallthrough
CT: control target
= control target key end

     0   :  { %v225_v3 = vmov 0.0|0.0   ;;  %v226_v6 = vmov 0.0   ;;  %vm227_vm0 = vmmov 0   ;;  %s307_s0 = inlined_call_operand.vmem [shape: f32[2,128], index: 0, kind: input, shape index: {}]   ;;  %s308_s1 = inlined_call_operand.vmem [shape: f32[128,128], index: 1, kind: input, shape index: {}]   ;;  %s309_s2 = inlined_call_operand.hbm [shape: f32[2,128], index: 2, kind: output, shape index: {}]  }
   0x1   :  { %v19_v0 = vld [vmem:[%s308_s1] sm:$0xff]  ;;  %v20_v1 = vld [vmem:[%s308_s1 + $0x8] sm:$0xff]  ;;  %v21_v2 = vld [vmem:[%s308_s1 + $0x10] sm:$0xff]  ;;  %173 = vmatprep.subr.bf16.mxu0 %v225_v3  ;;  %16 = vst [vmem:[#allocation2] sm:$0x3] %v226_v6  ;;  %170 = vmatprep.mubr.msk.f32.mxu0 %vm227_vm0, %v226_v6 }
   0x2   :  { %v174_v4 = vpack.c.bf16 %v20_v1, %v19_v0  ;;  %v22_v5 = vld [vmem:[%s308_s1 + $0x18] sm:$0xff]  ;;  %v23_v8 = vld [vmem:[%s308_s1 + $0x20] sm:$0xff]  ;;  %v24_v9 = vld [vmem:[%s308_s1 + $0x28] sm:$0xff] }
   0x3   :  { %v177_v7 = vpack.c.bf16 %v22_v5, %v21_v2 }
   0x4   :  { %175 = vmatpush3.bf16.msra.mxu0 %v174_v4 }
   0x5   :  { %176 = vmatprep.subr.bf16.mxu0 %v225_v3 }
   0x6   :  { %7 = vsyncpa [#allocation3], 0  ;;  %v180_v10 = vpack.c.bf16 %v24_v9, %v23_v8  ;;  %v25_v11 = vld [vmem:[%s308_s1 + $0x30] sm:$0xff]  ;;  %v26_v12 = vld [vmem:[%s308_s1 + $0x38] sm:$0xff]  ;;  %s228_s15 = smov [#allocation2]  }
   0x7   :  { %v183_v13 = vpack.c.bf16 %v26_v12, %v25_v11  ;;  %v27_v14 = vld [vmem:[%s308_s1 + $0x40] sm:$0xff]  ;;  %v28_v15 = vld [vmem:[%s308_s1 + $0x48] sm:$0xff]  ;;  %v29_v17 = vld [vmem:[%s308_s1 + $0x50] sm:$0xff]  ;;  %s113_s16 = sshll.u32 %s228_s15, 4  ;;  %s114_s16 = int_to_ptr.vmem [resolvable:$true] %s113_s16 }
   0x8   :  { %178 = vmatpush3.bf16.msra.mxu0 %v177_v7  ;;  %v186_v16 = vpack.c.bf16 %v28_v15, %v27_v14  ;;  %v30_v18 = vld [vmem:[%s308_s1 + $0x58] sm:$0xff]  ;;  %v31_v20 = vld [vmem:[%s308_s1 + $0x60] sm:$0xff]  ;;  %v32_v21 = vld [vmem:[%s308_s1 + $0x68] sm:$0xff]  ;;  %s201_s17 = scalar_lea.vmem %s114_s16, 32  ;;  %p206_p1 = scmp.lt.s32.totalorder %s114_s16, %s114_s16 }
   0x9   :  { %179 = vmatprep.subr.bf16.mxu0 %v225_v3  ;;  %v189_v19 = vpack.c.bf16 %v30_v18, %v29_v17  ;;  %v192_v22 = vpack.c.bf16 %v32_v21, %v31_v20  ;;  %v33_v23 = vld [vmem:[%s308_s1 + $0x70] sm:$0xff]  ;;  %v34_v24 = vld [vmem:[%s308_s1 + $0x78] sm:$0xff]  ;;  %v18_v26 = vld [vmem:[%s307_s0] sm:$0x3]  ;;  %p202_p0 = scmp.ne.s32.totalorder %s114_s16, %s201_s17  ;;  %p207_p2 = scmp.lt.s32.totalorder %s201_s17, %s201_s17 }
   0xa   :  { %v195_v25 = vpack.c.bf16 %v34_v24, %v33_v23  ;;  %v17_v27 = vld [vmem:[#allocation2] sm:$0x3] }
   0xb   :  { %p208_p3 = por %p207_p2, %p206_p1 }
   0xc   :  { %181 = vmatpush3.bf16.msra.mxu0 %v180_v10 }
   0xd   :  { %182 = vmatprep.subr.bf16.mxu0 %v225_v3  ;;  %p209_p4 = pnand %p208_p3, %p202_p0 }
  0x10   :  { %184 = vmatpush3.bf16.msra.mxu0 %v183_v13 }
  0x11   :  { %185 = vmatprep.subr.bf16.mxu0 %v225_v3 }
  0x14   :  { %187 = vmatpush3.bf16.msra.mxu0 %v186_v16 }
  0x15   :  { %188 = vmatprep.subr.bf16.mxu0 %v225_v3 }
  0x18   :  { %190 = vmatpush3.bf16.msra.mxu0 %v189_v19 }
  0x19   :  { %191 = vmatprep.subr.bf16.mxu0 %v225_v3 }
  0x1c   :  { %193 = vmatpush3.bf16.msra.mxu0 %v192_v22 }
  0x1d   :  { %194 = vmatprep.subr.bf16.mxu0 %v225_v3 }
  0x20   :  { %196 = vmatpush3.bf16.msra.mxu0 %v195_v25 }
  0x23   :  { %171 = vmatmul.mubr.f32.vlgmr.msra.gmra.mrb[0].mxu0 %v18_v26 }
  0xf6   :  { %v101_v28 = vpop.f32.mrb[0].mxu0 }
  0xf7   :  { %v105_v29 = vadd.f32 %v101_v28, %v17_v27  ;;  %v172_v30 = vpop.f32.mrb[1].mxu0 }
  0xf9   :  { %106 = vst [vmem:[#allocation2] sm:$0x3] %v105_v29 }
  0xfa   :  { %212 = shalt.err (!%p209_p4)
}
  0xfb   :  { %s213_s0 = scalar_lea.hbm %s309_s2, 32 }
  0xfc   :  { %p214_p5 = scmp.ne.s32.totalorder %s309_s2, %s213_s0  ;;  %p217_p6 = scmp.lt.u32.totalorder %s213_s0, %s309_s2 }
  0xfe   :  { %p219_p7 = pnand %p217_p6, %p214_p5 }
 0x100   :  { %222 = shalt.err (!%p219_p7)
}
 0x101   :  { %116 = dma.vmem_to_hbm [thread:$0]  %s114_s16, 32, %s309_s2, [#allocation3]  }
 0x102   :  { %223 = dma.done.wait [#allocation3], 32  }
 0x103   :  { %224 = vsyncadd [#allocation3], 4294967264 }
 0x104   :  { %120 = vsyncpa [#allocation3], 1 }

// kernel: gin_forward.4
= control target key start
LH: loop header
LB: loop body
LE: loop exit
PB: predicated region body
PF: predicated region fallthrough
CT: control target
= control target key end

     0   :  { %s893_s1 = inlined_call_operand.vmem [shape: f32[128,128], index: 1, kind: input, shape index: {}]   ;;  %s894_s0 = inlined_call_operand.vmem [shape: s8[128,128], index: 0, kind: input, shape index: {}]   ;;  %s895_s2 = inlined_call_operand.vmem [shape: f32[128,128], index: 2, kind: input, shape index: {}]   ;;  %s896_s3 = inlined_call_operand.vmem [shape: f32[1,128], index: 3, kind: input, shape index: {}]   ;;  %s897_s4 = inlined_call_operand.vmem [shape: f32[128,128], index: 4, kind: output, shape index: {}]  }
   0x1   :  { %v72_v0 = vld [vmem:[%s893_s1] sm:$0xff]  ;;  %v73_v1 = vld [vmem:[%s893_s1 + $0x8] sm:$0xff]  ;;  %v74_v2 = vld [vmem:[%s893_s1 + $0x10] sm:$0xff] }
   0x2   :  { %v88_v3 = vpack.c.bf16 %v73_v1, %v72_v0  ;;  %v75_v4 = vld [vmem:[%s893_s1 + $0x18] sm:$0xff]  ;;  %v76_v6 = vld [vmem:[%s893_s1 + $0x20] sm:$0xff]  ;;  %v77_v7 = vld [vmem:[%s893_s1 + $0x28] sm:$0xff] }
   0x3   :  { %v89_v5 = vpack.c.bf16 %v75_v4, %v74_v2  ;;  %v90_v8 = vpack.c.bf16 %v77_v7, %v76_v6  ;;  %v38_v9 = vld [vmem:[%s894_s0] sm:$0x3]  ;;  %v39_v10 = vld [vmem:[%s894_s0 + $0x2] sm:$0x3]  ;;  %v78_v11 = vld [vmem:[%s893_s1 + $0x30] sm:$0xff] }
   0x4   :  { %553 = vmatprep.subr.bf16.mxu0 %v88_v3  ;;  %v79_v12 = vld [vmem:[%s893_s1 + $0x38] sm:$0xff]  ;;  %v54_v13 = vunpack.c.l.s8.bf16 %v38_v9  ;;  %v55_v14 = vunpack.c.l.s8.bf16 %v39_v10  ;;  %v80_v17 = vld [vmem:[%s893_s1 + $0x40] sm:$0xff]  ;;  %v81_v18 = vld [vmem:[%s893_s1 + $0x48] sm:$0xff] }
   0x5   :  { %554 = vmatpush3.bf16.msra.mxu0 %v88_v3  ;;  %v91_v16 = vpack.c.bf16 %v79_v12, %v78_v11  ;;  %v308_v19 = vld [vmem:[%s895_s2] sm:$0xff]  ;;  %v309_v20 = vld [vmem:[%s895_s2 + $0x8] sm:$0xff]  ;;  %v310_v21 = vld [vmem:[%s895_s2 + $0x10] sm:$0xff]  ;;  %v92_v25 = vpack.c.bf16 %v81_v18, %v80_v17 }
   0x6   :  { %555 = vmatprep.subr.bf16.mxu0 %v89_v5  ;;  %v496_v15 = vcombine.low %v54_v13, %v55_v14  ;;  %v311_v22 = vld [vmem:[%s895_s2 + $0x18] sm:$0xff]  ;;  %v641_v23 = vpack.c.bf16 %v309_v20, %v308_v19  ;;  %v312_v26 = vld [vmem:[%s895_s2 + $0x20] sm:$0xff]  ;;  %v313_v27 = vld [vmem:[%s895_s2 + $0x28] sm:$0xff] }
   0x7   :  { %v645_v24 = vpack.c.bf16 %v311_v22, %v310_v21  ;;  %v82_v28 = vld [vmem:[%s893_s1 + $0x50] sm:$0xff]  ;;  %v83_v29 = vld [vmem:[%s893_s1 + $0x58] sm:$0xff]  ;;  %v649_v30 = vpack.c.bf16 %v313_v27, %v312_v26  ;;  %v84_v34 = vld [vmem:[%s893_s1 + $0x60] sm:$0xff] }
   0x8   :  { %569 = vmatprep.mubr.bf16.mxu0 %v496_v15  ;;  %642 = vmatprep.subr.bf16.mxu1 %v641_v23  ;;  %v93_v31 = vpack.c.bf16 %v83_v29, %v82_v28  ;;  %v314_v32 = vld [vmem:[%s895_s2 + $0x30] sm:$0xff]  ;;  %v315_v33 = vld [vmem:[%s895_s2 + $0x38] sm:$0xff]  ;;  %v85_v35 = vld [vmem:[%s893_s1 + $0x68] sm:$0xff] }
   0x9   :  { %556 = vmatpush3.bf16.msra.mxu0 %v89_v5  ;;  %644 = vmatpush3.bf16.msra.mxu1 %v641_v23  ;;  %v653_v36 = vpack.c.bf16 %v315_v33, %v314_v32  ;;  %v94_v37 = vpack.c.bf16 %v85_v35, %v84_v34  ;;  %v316_v38 = vld [vmem:[%s895_s2 + $0x40] sm:$0xff]  ;;  %v317_v39 = vld [vmem:[%s895_s2 + $0x48] sm:$0xff]  ;;  %v86_v40 = vld [vmem:[%s893_s1 + $0x70] sm:$0xff] }
   0xa   :  { %557 = vmatprep.subr.bf16.mxu0 %v90_v8  ;;  %646 = vmatprep.subr.bf16.mxu1 %v645_v24  ;;  %v87_v41 = vld [vmem:[%s893_s1 + $0x78] sm:$0xff]  ;;  %v40_v42 = vld [vmem:[%s894_s0 + $0x4] sm:$0x3]  ;;  %v41_v43 = vld [vmem:[%s894_s0 + $0x6] sm:$0x3]  ;;  %v657_v45 = vpack.c.bf16 %v317_v39, %v316_v38 }
   0xb   :  { %v42_v44 = vld [vmem:[%s894_s0 + $0x8] sm:$0x3]  ;;  %v95_v46 = vpack.c.bf16 %v87_v41, %v86_v40  ;;  %v43_v47 = vld [vmem:[%s894_s0 + $0xa] sm:$0x3]  ;;  %v318_v48 = vld [vmem:[%s895_s2 + $0x50] sm:$0xff]  ;;  %v56_v50 = vunpack.c.l.s8.bf16 %v40_v42  ;;  %v57_v51 = vunpack.c.l.s8.bf16 %v41_v43 }
   0xc   :  { %v319_v49 = vld [vmem:[%s895_s2 + $0x58] sm:$0xff]  ;;  %v58_v52 = vunpack.c.l.s8.bf16 %v42_v44  ;;  %v59_v53 = vunpack.c.l.s8.bf16 %v43_v47  ;;  %v320_v55 = vld [vmem:[%s895_s2 + $0x60] sm:$0xff]  ;;  %v321_v56 = vld [vmem:[%s895_s2 + $0x68] sm:$0xff] }
   0xd   :  { %558 = vmatpush3.bf16.msra.mxu0 %v90_v8  ;;  %648 = vmatpush3.bf16.msra.mxu1 %v645_v24  ;;  %v661_v54 = vpack.c.bf16 %v319_v49, %v318_v48  ;;  %v497_v57 = vcombine.low %v56_v50, %v57_v51  ;;  %v44_v59 = vld [vmem:[%s894_s0 + $0xc] sm:$0x3]  ;;  %v45_v60 = vld [vmem:[%s894_s0 + $0xe] sm:$0x3]  ;;  %v665_v61 = vpack.c.bf16 %v321_v56, %v320_v55  ;;  %v46_v62 = vld [vmem:[%s894_s0 + $0x10] sm:$0x3] }
   0xe   :  { %559 = vmatprep.subr.bf16.mxu0 %v91_v16  ;;  %650 = vmatprep.subr.bf16.mxu1 %v649_v30  ;;  %v498_v58 = vcombine.low %v58_v52, %v59_v53  ;;  %v47_v63 = vld [vmem:[%s894_s0 + $0x12] sm:$0x3]  ;;  %v60_v0 = vunpack.c.l.s8.bf16 %v44_v59  ;;  %v61_v1 = vunpack.c.l.s8.bf16 %v45_v60  ;;  %v62_v2 = vunpack.c.l.s8.bf16 %v46_v62  ;;  %v48_v6 = vld [vmem:[%s894_s0 + $0x14] sm:$0x3]  ;;  %v49_v7 = vld [vmem:[%s894_s0 + $0x16] sm:$0x3] }
   0xf   :  { %v63_v3 = vunpack.c.l.s8.bf16 %v47_v63  ;;  %v50_v8 = vld [vmem:[%s894_s0 + $0x18] sm:$0x3]  ;;  %v51_v9 = vld [vmem:[%s894_s0 + $0x1a] sm:$0x3]  ;;  %v64_v10 = vunpack.c.l.s8.bf16 %v48_v6  ;;  %v65_v11 = vunpack.c.l.s8.bf16 %v49_v7  ;;  %v53_v17 = vld [vmem:[%s894_s0 + $0x1e] sm:$0x3] }
  0x10   :  { %v499_v4 = vcombine.low %v60_v0, %v61_v1  ;;  %v66_v12 = vunpack.c.l.s8.bf16 %v50_v8  ;;  %v67_v13 = vunpack.c.l.s8.bf16 %v51_v9  ;;  %v69_v19 = vunpack.c.l.s8.bf16 %v53_v17  ;;  %v322_v21 = vld [vmem:[%s895_s2 + $0x70] sm:$0xff]  ;;  %v323_v22 = vld [vmem:[%s895_s2 + $0x78] sm:$0xff]  ;;  %v504_v40 = vld [vmem:[%s896_s3] ss:$0 sm:$0xff] }
  0x11   :  { %560 = vmatpush3.bf16.msra.mxu0 %v91_v16  ;;  %652 = vmatpush3.bf16.msra.mxu1 %v649_v30  ;;  %v500_v5 = vcombine.low %v62_v2, %v63_v3  ;;  %v501_v14 = vcombine.low %v64_v10, %v65_v11  ;;  %v52_v16 = vld [vmem:[%s894_s0 + $0x1c] sm:$0x3]  ;;  %v669_v23 = vpack.c.bf16 %v323_v22, %v322_v21 }
  0x12   :  { %561 = vmatprep.subr.bf16.mxu0 %v92_v25  ;;  %654 = vmatprep.subr.bf16.mxu1 %v653_v36  ;;  %v502_v15 = vcombine.low %v66_v12, %v67_v13  ;;  %v68_v18 = vunpack.c.l.s8.bf16 %v52_v16 }
  0x14   :  { %v503_v20 = vcombine.low %v68_v18, %v69_v19 }
  0x15   :  { %562 = vmatpush3.bf16.msra.mxu0 %v92_v25  ;;  %656 = vmatpush3.bf16.msra.mxu1 %v653_v36 }
  0x16   :  { %563 = vmatprep.subr.bf16.mxu0 %v93_v31  ;;  %658 = vmatprep.subr.bf16.mxu1 %v657_v45 }
  0x19   :  { %564 = vmatpush3.bf16.msra.mxu0 %v93_v31  ;;  %660 = vmatpush3.bf16.msra.mxu1 %v657_v45 }
  0x1a   :  { %565 = vmatprep.subr.bf16.mxu0 %v94_v37  ;;  %662 = vmatprep.subr.bf16.mxu1 %v661_v54 }
  0x1d   :  { %566 = vmatpush3.bf16.msra.mxu0 %v94_v37  ;;  %664 = vmatpush3.bf16.msra.mxu1 %v661_v54 }
  0x1e   :  { %567 = vmatprep.subr.bf16.mxu0 %v95_v46  ;;  %666 = vmatprep.subr.bf16.mxu1 %v665_v61 }
  0x21   :  { %568 = vmatpush3.bf16.msra.mxu0 %v95_v46  ;;  %668 = vmatpush3.bf16.msra.mxu1 %v665_v61 }
  0x22   :  { %670 = vmatprep.subr.bf16.mxu1 %v669_v23 }
  0x24   :  { %570 = vmatmul.mubr.bf16.vlgmr.msra.gmra.mrb[0].mxu0 %v497_v57 }
  0x25   :  { %573 = vmatprep.mubr.bf16.mxu0 %v498_v58  ;;  %672 = vmatpush3.bf16.msra.mxu1 %v669_v23 }
  0x2c   :  { %574 = vmatmul.mubr.bf16.gmra.mrb[4].mxu0 %v499_v4 }
  0x2d   :  { %577 = vmatprep.mubr.bf16.mxu0 %v500_v5 }
  0x34   :  { %578 = vmatmul.mubr.bf16.gmra.mrb[8].mxu0 %v501_v14 }
  0x35   :  { %581 = vmatprep.mubr.bf16.mxu0 %v502_v15 }
  0x3c   :  { %582 = vmatmul.mubr.bf16.gmra.mrb[12].mxu0 %v503_v20 }
  0xf7   :  { %v571_v24 = vpop.f32.mrb[0].mxu0 }
  0xf8   :  { %v194_v25 = vpop.f32.mrb[1].mxu0 }
  0xf9   :  { %v572_v26 = vpop.f32.mrb[2].mxu0  ;;  %617 = vmatprep.mubr.f32.mxu1 %v194_v25 }
  0xfa   :  { %v197_v27 = vpop.f32.mrb[3].mxu0 }
  0xfb   :  { %618 = vmatmul.mubr.f32.vlgmr.msra.gmra.mrb[0].mxu1 %v197_v27 }
  0xfc   :  { %620 = vmatprep.mubr.f32.mxu1 %v571_v24 }
  0xff   :  { %v575_v28 = vpop.f32.mrb[4].mxu0  ;;  %621 = vmatmul.mubr.f32.gmra.mrb[2].mxu1 %v572_v26 }
 0x100   :  { %v210_v29 = vpop.f32.mrb[5].mxu0 }
 0x101   :  { %v576_v30 = vpop.f32.mrb[6].mxu0  ;;  %623 = vmatprep.mubr.f32.mxu1 %v210_v29 }
 0x102   :  { %v213_v31 = vpop.f32.mrb[7].mxu0 }
 0x103   :  { %624 = vmatmul.mubr.f32.gmra.mrb[4].mxu1 %v213_v31 }
 0x104   :  { %626 = vmatprep.mubr.f32.mxu1 %v575_v28 }
 0x107   :  { %v579_v32 = vpop.f32.mrb[8].mxu0  ;;  %627 = vmatmul.mubr.f32.gmra.mrb[6].mxu1 %v576_v30 }
 0x108   :  { %v226_v33 = vpop.f32.mrb[9].mxu0 }
 0x109   :  { %v580_v34 = vpop.f32.mrb[10].mxu0  ;;  %629 = vmatprep.mubr.f32.mxu1 %v226_v33 }
 0x10a   :  { %v229_v35 = vpop.f32.mrb[11].mxu0 }
 0x10b   :  { %630 = vmatmul.mubr.f32.gmra.mrb[8].mxu1 %v229_v35 }
 0x10c   :  { %632 = vmatprep.mubr.f32.mxu1 %v579_v32 }
 0x10f   :  { %v583_v36 = vpop.f32.mrb[12].mxu0  ;;  %633 = vmatmul.mubr.f32.gmra.mrb[10].mxu1 %v580_v34 }
 0x110   :  { %v242_v37 = vpop.f32.mrb[13].mxu0 }
 0x111   :  { %v584_v38 = vpop.f32.mrb[14].mxu0  ;;  %635 = vmatprep.mubr.f32.mxu1 %v242_v37 }
 0x112   :  { %v245_v39 = vpop.f32.mrb[15].mxu0 }
 0x113   :  { %636 = vmatmul.mubr.f32.gmra.mrb[12].mxu1 %v245_v39 }
 0x114   :  { %638 = vmatprep.mubr.f32.mxu1 %v583_v36 }
 0x117   :  { %639 = vmatmul.mubr.f32.gmra.mrb[14].mxu1 %v584_v38 }
 0x1ce   :  { %v619_v41 = vpop.f32.mrb[0].mxu1 }
 0x1cf   :  { %v403_v42 = vadd.f32 %v619_v41, %v504_v40  ;;  %v397_v43 = vpop.f32.mrb[1].mxu1 }
 0x1d0   :  { %v398_v44 = vadd.f32 %v504_v40, %v397_v43 }
 0x1d1   :  { %477 = vst [vmem:[%s897_s4 + $0x8] sm:$0xff] %v403_v42 }
 0x1d2   :  { %476 = vst [vmem:[%s897_s4] sm:$0xff] %v398_v44  ;;  %v622_v45 = vpop.f32.mrb[2].mxu1 }
 0x1d3   :  { %v413_v46 = vadd.f32 %v622_v45, %v504_v40  ;;  %v407_v47 = vpop.f32.mrb[3].mxu1 }
 0x1d4   :  { %v408_v48 = vadd.f32 %v504_v40, %v407_v47 }
 0x1d5   :  { %479 = vst [vmem:[%s897_s4 + $0x18] sm:$0xff] %v413_v46 }
 0x1d6   :  { %478 = vst [vmem:[%s897_s4 + $0x10] sm:$0xff] %v408_v48  ;;  %v625_v49 = vpop.f32.mrb[4].mxu1 }
 0x1d7   :  { %v423_v50 = vadd.f32 %v625_v49, %v504_v40  ;;  %v417_v51 = vpop.f32.mrb[5].mxu1 }
 0x1d8   :  { %v418_v52 = vadd.f32 %v504_v40, %v417_v51 }
 0x1d9   :  { %481 = vst [vmem:[%s897_s4 + $0x28] sm:$0xff] %v423_v50 }
 0x1da   :  { %480 = vst [vmem:[%s897_s4 + $0x20] sm:$0xff] %v418_v52  ;;  %v628_v53 = vpop.f32.mrb[6].mxu1 }
 0x1db   :  { %v433_v54 = vadd.f32 %v628_v53, %v504_v40  ;;  %v427_v55 = vpop.f32.mrb[7].mxu1 }
 0x1dc   :  { %v428_v56 = vadd.f32 %v504_v40, %v427_v55 }
 0x1dd   :  { %483 = vst [vmem:[%s897_s4 + $0x38] sm:$0xff] %v433_v54 }
 0x1de   :  { %482 = vst [vmem:[%s897_s4 + $0x30] sm:$0xff] %v428_v56  ;;  %v631_v57 = vpop.f32.mrb[8].mxu1 }
 0x1df   :  { %v443_v58 = vadd.f32 %v631_v57, %v504_v40  ;;  %v437_v59 = vpop.f32.mrb[9].mxu1 }
 0x1e0   :  { %v438_v60 = vadd.f32 %v504_v40, %v437_v59 }
 0x1e1   :  { %485 = vst [vmem:[%s897_s4 + $0x48] sm:$0xff] %v443_v58 }
 0x1e2   :  { %484 = vst [vmem:[%s897_s4 + $0x40] sm:$0xff] %v438_v60  ;;  %v634_v61 = vpop.f32.mrb[10].mxu1 }
 0x1e3   :  { %v453_v62 = vadd.f32 %v634_v61, %v504_v40  ;;  %v447_v63 = vpop.f32.mrb[11].mxu1 }
 0x1e4   :  { %v448_v0 = vadd.f32 %v504_v40, %v447_v63 }
 0x1e5   :  { %487 = vst [vmem:[%s897_s4 + $0x58] sm:$0xff] %v453_v62 }
 0x1e6   :  { %486 = vst [vmem:[%s897_s4 + $0x50] sm:$0xff] %v448_v0  ;;  %v637_v1 = vpop.f32.mrb[12].mxu1 }
 0x1e7   :  { %v463_v2 = vadd.f32 %v637_v1, %v504_v40  ;;  %v457_v3 = vpop.f32.mrb[13].mxu1 }
 0x1e8   :  { %v458_v4 = vadd.f32 %v504_v40, %v457_v3 }
 0x1e9   :  { %489 = vst [vmem:[%s897_s4 + $0x68] sm:$0xff] %v463_v2 }
 0x1ea   :  { %488 = vst [vmem:[%s897_s4 + $0x60] sm:$0xff] %v458_v4  ;;  %v640_v5 = vpop.f32.mrb[14].mxu1 }
 0x1eb   :  { %v473_v6 = vadd.f32 %v640_v5, %v504_v40  ;;  %v467_v7 = vpop.f32.mrb[15].mxu1 }
 0x1ec   :  { %v468_v8 = vadd.f32 %v504_v40, %v467_v7 }
 0x1ed   :  { %491 = vst [vmem:[%s897_s4 + $0x78] sm:$0xff] %v473_v6 }
 0x1ee   :  { %490 = vst [vmem:[%s897_s4 + $0x70] sm:$0xff] %v468_v8 }

</bundles_post_ra>
